<compile_context>
chip_gen: v7x
topology: tpu7x:2x2x1
jax: 0.10.0
libtpu: 0.0.40
codegen_flags: <defaults>
</compile_context>

<pallas_src>
import math

import jax
import jax.numpy as jnp
from jax.experimental import pallas as pl
from jax.experimental.pallas import tpu as pltpu


def _round_up(a, b):
    return (a + b - 1) // b * b


def _tpu_info():
    try:
        return pltpu.get_tpu_info()
    except Exception:
        return None


def _vmem_capacity_bytes():
    info = _tpu_info()
    if info is not None:
        for attr in ("vmem_capacity_bytes", "vmem_bytes", "vmem_capacity"):
            val = getattr(info, attr, None)
            if val:
                return int(val)
    return 64 * 1024 * 1024        # conservative (v7x-sized) default


def _num_tensorcores():
    info = _tpu_info()
    if info is not None:
        for attr in ("num_cores", "core_count", "num_tensorcores", "cores_per_chip"):
            val = getattr(info, attr, None)
            if val:
                return int(val)
    return 1                       # assume single TensorCore if unknown


def _make_gdice_stats_kernel(C, chunk, n_chunks, fuse_softmax):
    """Streaming per-class partial sums over the spatial (lane) axis.

    Refs:
      x_ref:   (1, C, TS)   logits (fuse_softmax=True) or probabilities, native dtype
      lab_ref: (1, 1, TS)   int8/int16/int32 labels; padded positions hold -1
      out_ref: (1, 1, C, 3) f32 running sums, resident across the s grid axis:
                 col 0: intersect = sum(p * onehot)
                 col 1: xsum      = sum(p)
                 col 2: tsum      = sum(onehot)
    """
    unroll = n_chunks if n_chunks <= 8 else 8

    def kernel(x_ref, lab_ref, out_ref):
        s = pl.program_id(2)

        @pl.when(s == 0)
        def _():
            out_ref[...] = jnp.zeros_like(out_ref)

        def body(i, carry):
            tp, xs, cnt = carry
            off = pl.multiple_of(i * chunk, chunk)
            x = x_ref[:, :, pl.ds(off, chunk)].astype(jnp.float32)    # (1,C,chunk)
            lab = lab_ref[:, :, pl.ds(off, chunk)].astype(jnp.int32)  # (1,1,chunk)

            if fuse_softmax:
                # Numerically-stable softmax over the class (sublane) axis,
                # fused into the streaming pass (exp on EUP, approx recip).
                xmax = jnp.max(x, axis=1, keepdims=True)              # (1,1,chunk)
                e = jnp.exp(x - xmax)
                denom = jnp.sum(e, axis=1, keepdims=True)             # (1,1,chunk)
                # Padded lanes carry label -1: zero their probabilities so the
                # per-class xsum only counts real pixels (folded into the
                # per-position scale, no extra per-element multiply).
                valid = (lab >= 0).astype(jnp.float32)                # (1,1,chunk)
                x = e * (pl.reciprocal(denom, approx=True) * valid)

            ch = jax.lax.broadcasted_iota(jnp.int32, (1, C, chunk), 1)
            mf = (jnp.broadcast_to(lab, (1, C, chunk)) == ch).astype(jnp.float32)

            tp = tp + jnp.sum(x * mf, axis=-1, keepdims=True)         # (1,C,1)
            xs = xs + jnp.sum(x, axis=-1, keepdims=True)              # (1,C,1)
            cnt = cnt + jnp.sum(mf, axis=-1, keepdims=True)           # (1,C,1)
            return tp, xs, cnt

        z = jnp.zeros((1, C, 1), jnp.float32)
        tp, xs, cnt = jax.lax.fori_loop(0, n_chunks, body, (z, z, z),
                                        unroll=unroll)

        # Assemble the (1, C, 3) partial with lane-broadcasts + selects
        # (avoids a minor-dim concatenate) and commit with a SINGLE
        # accumulator read-modify-write per grid step.
        col = jax.lax.broadcasted_iota(jnp.int32, (1, C, 3), 2)
        partial = (jnp.where(col == 0, tp, 0.0)
                   + jnp.where(col == 1, xs, 0.0)
                   + jnp.where(col == 2, cnt, 0.0))
        out_ref[...] += partial.reshape(1, 1, C, 3)

    return kernel


def gdice_loss_v2(net_output, target, *, smooth=1e-5, apply_nonlin="softmax",
                  block_bytes=None, num_splits=None):
    """Generalized Dice loss V2 (forward only).

    net_output: (B, C, *spatial) logits (apply_nonlin="softmax": softmax fused
                in-kernel) or probabilities (apply_nonlin=None).
    target:     (B, *spatial) integer label map (a (B, 1, *spatial) map is OK).
    """
    fuse_softmax = isinstance(apply_nonlin, str) and apply_nonlin.lower() == "softmax"
    if not fuse_softmax and callable(apply_nonlin):
        # TODO(synk): arbitrary apply_nonlin callables run as plain JAX here
        # (not fused); only softmax-over-classes is fused into the kernel.
        net_output = apply_nonlin(net_output)

    shp = net_output.shape
    B, C = int(shp[0]), int(shp[1])
    S = int(math.prod(shp[2:]))

    if target.ndim == net_output.ndim:
        if target.shape[1] == 1:
            target = jnp.squeeze(target, axis=1)
        else:
            # TODO(synk): the "gt already one-hot / soft labels" branch of the
            # module is not implemented; only integer label maps are supported.
            raise NotImplementedError("one-hot / soft targets not supported")

    x = net_output.reshape(B, C, S)                       # native dtype (f32/bf16)
    lab_dtype = jnp.int8 if C <= 127 else (jnp.int16 if C <= 32767 else jnp.int32)
    lab = target.astype(lab_dtype).reshape(B, 1, S)

    itemsize = jnp.dtype(x.dtype).itemsize
    lab_itemsize = jnp.dtype(lab_dtype).itemsize

    # ---- generation-aware tile sizing ---------------------------------------
    vmem_cap = _vmem_capacity_bytes()
    if block_bytes is None:
        # v5e/v6e (128 MiB VMEM): 8 MiB x-blocks; v7x (64 MiB VMEM): 6 MiB.
        block_bytes = (8 * 1024 * 1024 if vmem_cap >= 96 * 1024 * 1024
                       else 6 * 1024 * 1024)
    vmem_limit = int(min(max(vmem_cap * 3 // 4, 32 * 1024 * 1024),
                         64 * 1024 * 1024))

    s_ceil = _round_up(S, 128)
    # Inner compute chunk (lanes): bounds the f32-upcast / one-hot temporaries
    # so the DMA tile (TS) can grow without blowing VMEM or vregs.
    chunk = min(4096, max(256, ((64 * 1024) // max(C, 1)) // 128 * 128))
    chunk = min(chunk, s_ceil)
    lanes_per_tile = max(chunk,
                         (block_bytes // max(C * itemsize, 1)) // chunk * chunk)
    n_tiles = max(1, pl.cdiv(s_ceil, lanes_per_tile))
    n_chunks = pl.cdiv(pl.cdiv(s_ceil, n_tiles), chunk)
    TS = n_chunks * chunk
    S_pad = TS * n_tiles

    # ---- optional 2-way spatial split: keep both TensorCores busy for odd B -
    if num_splits is None:
        num_splits = 2 if (_num_tensorcores() >= 2 and B % 2 == 1
                           and n_tiles >= 2 and n_tiles % 2 == 0) else 1
    if num_splits < 1 or n_tiles % num_splits != 0:
        num_splits = 1
    tiles_per_split = n_tiles // num_splits

    if S_pad != S:
        pad = S_pad - S
        x = jnp.pad(x, ((0, 0), (0, 0), (0, pad)))                    # zeros
        lab = jnp.pad(lab, ((0, 0), (0, 0), (0, pad)),
                      constant_values=-1)                             # "no pixel"

    kernel = _make_gdice_stats_kernel(C, chunk, n_chunks, fuse_softmax)

    flops_per_elem = 10 if fuse_softmax else 6
    cost = pl.CostEstimate(
        flops=int(flops_per_elem * B * C * S_pad),
        transcendentals=int(B * C * S_pad) if fuse_softmax else 0,
        bytes_accessed=int(B * C * S_pad * itemsize + B * S_pad * lab_itemsize
                           + B * num_splits * C * 3 * 4),
    )

    stats = pl.pallas_call(
        kernel,
        out_shape=jax.ShapeDtypeStruct((B, num_splits, C, 3), jnp.float32),
        grid_spec=pltpu.PrefetchScalarGridSpec(
            num_scalar_prefetch=0,
            grid=(B, num_splits, tiles_per_split),
            in_specs=[
                pl.BlockSpec((1, C, TS),
                             lambda b, p, s: (b, 0, p * tiles_per_split + s)),
                pl.BlockSpec((1, 1, TS),
                             lambda b, p, s: (b, 0, p * tiles_per_split + s)),
            ],
            out_specs=pl.BlockSpec((1, 1, C, 3), lambda b, p, s: (b, p, 0, 0)),
        ),
        compiler_params=pltpu.CompilerParams(
            dimension_semantics=("parallel", "parallel", "arbitrary"),
            vmem_limit_bytes=vmem_limit,
        ),
        cost_estimate=cost,
    )(x, lab)

    # ---- tiny GDiceLossV2 combine (plain JAX on a (C, 3) array) -------------
    stats = stats.reshape(B * num_splits, C, 3).sum(axis=0)           # (C, 3)
    intersect_c, xsum_c, tsum_c = stats[:, 0], stats[:, 1], stats[:, 2]

    class_weights = 1.0 / jnp.maximum(tsum_c * tsum_c, smooth)
    intersect = jnp.sum(intersect_c * class_weights)
    denominator = jnp.sum((xsum_c + tsum_c) * class_weights)
    return 1.0 - 2.0 * intersect / jnp.maximum(denominator, smooth)


if __name__ == "__main__":
    key = jax.random.PRNGKey(0)
    kx, ky = jax.random.split(key)

    B, C, H, W = 2, 4, 16, 16
    logits = jax.random.normal(kx, (B, C, H, W), dtype=jnp.float32)
    target = jax.random.randint(ky, (B, H, W), 0, C, dtype=jnp.int32)

    # pure-JAX reference mirroring the PyTorch forward
    def gdice_ref(probs, labels, smooth=1e-5):
        Cn = probs.shape[1]
        probs = probs.astype(jnp.float32)
        y1h = jax.nn.one_hot(labels, Cn, axis=1, dtype=jnp.float32)
        inp = jnp.transpose(probs, (1, 0, 2, 3)).reshape(Cn, -1)
        tgt = jnp.transpose(y1h, (1, 0, 2, 3)).reshape(Cn, -1)
        tsum = tgt.sum(-1)
        w = 1.0 / jnp.maximum(tsum * tsum, smooth)
        intersect = jnp.sum((inp * tgt).sum(-1) * w)
        denom = jnp.sum((inp + tgt).sum(-1) * w)
        return 1.0 - 2.0 * intersect / jnp.maximum(denom, smooth)

    # 1) fused path: raw f32 logits in, softmax over C done inside the kernel.
    out = jax.block_until_ready(gdice_loss_v2(logits, target))
    ref = gdice_ref(jax.nn.softmax(logits, axis=1), target)
    assert jnp.allclose(out, ref, rtol=3e-3, atol=3e-3), (out, ref)

    # 2) probabilities-in path: bf16 streaming, f32 accumulation in-kernel.
    probs_bf16 = jax.nn.softmax(logits, axis=1).astype(jnp.bfloat16)
    out_bf16 = jax.block_until_ready(
        gdice_loss_v2(probs_bf16, target, apply_nonlin=None))
    ref_bf16 = gdice_ref(probs_bf16.astype(jnp.float32), target)
    assert jnp.allclose(out_bf16, ref_bf16, rtol=3e-3, atol=3e-3), (
        out_bf16, ref_bf16)

    print("KERNEL_OK")
</pallas_src>

<mosaic_0001>
module attributes {stable_mosaic.version = 11 : i64} {
  func.func @kernel(%arg0: i32, %arg1: i32, %arg2: i32, %arg3: memref<1x4x256xf32, #tpu.memory_space<vmem>>, %arg4: memref<1x1x256xi8, #tpu.memory_space<vmem>>, %arg5: memref<1x1x4x3xf32, #tpu.memory_space<vmem>>) attributes {dimension_semantics = [#tpu.dimension_semantics<parallel>, #tpu.dimension_semantics<parallel>, #tpu.dimension_semantics<arbitrary>], iteration_bounds = array<i64: 2, 1, 1>, scalar_prefetch = 0 : i64, scratch_operands = 0 : i64, tpu.core_type = #tpu.core_type<tc>, window_params = [{transform_indices = @transform_0, window_bounds = array<i64: 1, 4, 256>}, {transform_indices = @transform_1, window_bounds = array<i64: 1, 1, 256>}, {transform_indices = @transform_2, window_bounds = array<i64: 1, 1, 4, 3>}]} {
    %c0_i32 = arith.constant 0 : i32
    %0 = arith.cmpi eq, %arg2, %c0_i32 : i32
    %1 = arith.extui %0 : i1 to i32
    %c0_i32_0 = arith.constant 0 : i32
    %2 = arith.cmpi ne, %1, %c0_i32_0 : i32
    scf.if %2 {
      %cst_24 = arith.constant 0.000000e+00 : f32
      %67 = vector.broadcast %cst_24 : f32 to vector<1x1x4x3xf32>
      %c0_25 = arith.constant 0 : index
      %c0_26 = arith.constant 0 : index
      %c0_27 = arith.constant 0 : index
      %c0_28 = arith.constant 0 : index
      %68 = vector.load %arg5[%c0_25, %c0_26, %c0_27, %c0_28] : memref<1x1x4x3xf32, #tpu.memory_space<vmem>>, vector<1x1x4x3xf32>
      tpu.vector_store %arg5[%c0_25, %c0_26, %c0_27, %c0_28], %67 {strides = array<i32>} : memref<1x1x4x3xf32, #tpu.memory_space<vmem>>, vector<1x1x4x3xf32>,
    } else {
    }
    %cst = arith.constant 0.000000e+00 : f32
    %3 = vector.broadcast %cst : f32 to vector<1x4x1xf32>
    %c0_i32_1 = arith.constant 0 : i32
    %c256_i32 = arith.constant 256 : i32
    %4 = arith.muli %c0_i32_1, %c256_i32 : i32
    %5 = tpu.assume_multiple %4, 256 : i32
    %c0 = arith.constant 0 : index
    %c0_2 = arith.constant 0 : index
    %6 = arith.index_cast %5 : i32 to index
    %7 = vector.load %arg3[%c0, %c0_2, %6] : memref<1x4x256xf32, #tpu.memory_space<vmem>>, vector<1x4x256xf32>
    %c0_3 = arith.constant 0 : index
    %c0_4 = arith.constant 0 : index
    %8 = arith.index_cast %5 : i32 to index
    %9 = vector.load %arg4[%c0_3, %c0_4, %8] : memref<1x1x256xi8, #tpu.memory_space<vmem>>, vector<1x1x256xi8>
    %10 = arith.extsi %9 : vector<1x1x256xi8> to vector<1x1x256xi32>
    %cst_5 = arith.constant dense<0xFF800000> : vector<1x256xf32>
    %11 = vector.multi_reduction <maximumf>, %7, %cst_5 [1] : vector<1x4x256xf32> to vector<1x256xf32>
    %12 = vector.shape_cast %11 : vector<1x256xf32> to vector<1x1x256xf32>
    %13 = vector.broadcast %12 : vector<1x1x256xf32> to vector<1x4x256xf32>
    %14 = arith.subf %7, %13 : vector<1x4x256xf32>
    %15 = math.exp %14 : vector<1x4x256xf32>
    %cst_6 = arith.constant dense<0.000000e+00> : vector<1x256xf32>
    %16 = vector.multi_reduction <add>, %15, %cst_6 [1] : vector<1x4x256xf32> to vector<1x256xf32>
    %17 = vector.shape_cast %16 : vector<1x256xf32> to vector<1x1x256xf32>
    %c0_i32_7 = arith.constant 0 : i32
    %18 = vector.broadcast %c0_i32_7 : i32 to vector<1x1x256xi32>
    %19 = arith.cmpi sge, %10, %18 : vector<1x1x256xi32>
    %20 = arith.extui %19 : vector<1x1x256xi1> to vector<1x1x256xi32>
    %21 = arith.sitofp %20 : vector<1x1x256xi32> to vector<1x1x256xf32>
    %22 = tpu.reciprocal %17 {approx = true} : vector<1x1x256xf32> -> vector<1x1x256xf32>
    %23 = arith.mulf %22, %21 : vector<1x1x256xf32>
    %24 = vector.broadcast %23 : vector<1x1x256xf32> to vector<1x4x256xf32>
    %25 = arith.mulf %15, %24 : vector<1x4x256xf32>
    %26 = tpu.iota {dimensions = array<i32: 1>} : vector<1x4x256xi32>
    %27 = vector.shape_cast %10 : vector<1x1x256xi32> to vector<1x1x256xi32>
    %28 = vector.broadcast %27 : vector<1x1x256xi32> to vector<1x4x256xi32>
    %29 = arith.cmpi eq, %28, %26 : vector<1x4x256xi32>
    %30 = arith.extui %29 : vector<1x4x256xi1> to vector<1x4x256xi32>
    %31 = arith.sitofp %30 : vector<1x4x256xi32> to vector<1x4x256xf32>
    %32 = arith.mulf %25, %31 : vector<1x4x256xf32>
    %cst_8 = arith.constant dense<0.000000e+00> : vector<1x4xf32>
    %33 = vector.multi_reduction <add>, %32, %cst_8 [2] : vector<1x4x256xf32> to vector<1x4xf32>
    %34 = vector.shape_cast %33 : vector<1x4xf32> to vector<1x4x1xf32>
    %35 = arith.addf %3, %34 : vector<1x4x1xf32>
    %cst_9 = arith.constant dense<0.000000e+00> : vector<1x4xf32>
    %36 = vector.multi_reduction <add>, %25, %cst_9 [2] : vector<1x4x256xf32> to vector<1x4xf32>
    %37 = vector.shape_cast %36 : vector<1x4xf32> to vector<1x4x1xf32>
    %38 = arith.addf %3, %37 : vector<1x4x1xf32>
    %cst_10 = arith.constant dense<0.000000e+00> : vector<1x4xf32>
    %39 = vector.multi_reduction <add>, %31, %cst_10 [2] : vector<1x4x256xf32> to vector<1x4xf32>
    %40 = vector.shape_cast %39 : vector<1x4xf32> to vector<1x4x1xf32>
    %41 = arith.addf %3, %40 : vector<1x4x1xf32>
    %c1_i32 = arith.constant 1 : i32
    %42 = tpu.iota {dimensions = array<i32: 2>} : vector<1x4x3xi32>
    %c0_i32_11 = arith.constant 0 : i32
    %43 = vector.broadcast %c0_i32_11 : i32 to vector<1x4x3xi32>
    %44 = arith.cmpi eq, %42, %43 : vector<1x4x3xi32>
    %cst_12 = arith.constant 0.000000e+00 : f32
    %45 = vector.shape_cast %35 : vector<1x4x1xf32> to vector<1x4x1xf32>
    %46 = vector.broadcast %45 : vector<1x4x1xf32> to vector<1x4x3xf32>
    %47 = vector.broadcast %cst_12 : f32 to vector<1x4x3xf32>
    %48 = arith.select %44, %46, %47 : vector<1x4x3xi1>, vector<1x4x3xf32>
    %c1_i32_13 = arith.constant 1 : i32
    %49 = vector.broadcast %c1_i32_13 : i32 to vector<1x4x3xi32>
    %50 = arith.cmpi eq, %42, %49 : vector<1x4x3xi32>
    %cst_14 = arith.constant 0.000000e+00 : f32
    %51 = vector.shape_cast %38 : vector<1x4x1xf32> to vector<1x4x1xf32>
    %52 = vector.broadcast %51 : vector<1x4x1xf32> to vector<1x4x3xf32>
    %53 = vector.broadcast %cst_14 : f32 to vector<1x4x3xf32>
    %54 = arith.select %50, %52, %53 : vector<1x4x3xi1>, vector<1x4x3xf32>
    %55 = arith.addf %48, %54 : vector<1x4x3xf32>
    %c2_i32 = arith.constant 2 : i32
    %56 = vector.broadcast %c2_i32 : i32 to vector<1x4x3xi32>
    %57 = arith.cmpi eq, %42, %56 : vector<1x4x3xi32>
    %cst_15 = arith.constant 0.000000e+00 : f32
    %58 = vector.shape_cast %41 : vector<1x4x1xf32> to vector<1x4x1xf32>
    %59 = vector.broadcast %58 : vector<1x4x1xf32> to vector<1x4x3xf32>
    %60 = vector.broadcast %cst_15 : f32 to vector<1x4x3xf32>
    %61 = arith.select %57, %59, %60 : vector<1x4x3xi1>, vector<1x4x3xf32>
    %62 = arith.addf %55, %61 : vector<1x4x3xf32>
    %c0_16 = arith.constant 0 : index
    %c0_17 = arith.constant 0 : index
    %c0_18 = arith.constant 0 : index
    %c0_19 = arith.constant 0 : index
    %63 = vector.load %arg5[%c0_16, %c0_17, %c0_18, %c0_19] : memref<1x1x4x3xf32, #tpu.memory_space<vmem>>, vector<1x1x4x3xf32>
    %64 = vector.shape_cast %62 : vector<1x4x3xf32> to vector<1x1x4x3xf32>
    %65 = arith.addf %63, %64 : vector<1x1x4x3xf32>
    %c0_20 = arith.constant 0 : index
    %c0_21 = arith.constant 0 : index
    %c0_22 = arith.constant 0 : index
    %c0_23 = arith.constant 0 : index
    %66 = vector.load %arg5[%c0_20, %c0_21, %c0_22, %c0_23] : memref<1x1x4x3xf32, #tpu.memory_space<vmem>>, vector<1x1x4x3xf32>
    tpu.vector_store %arg5[%c0_20, %c0_21, %c0_22, %c0_23], %65 {strides = array<i32>} : memref<1x1x4x3xf32, #tpu.memory_space<vmem>>, vector<1x1x4x3xf32>,
    return
  }
  func.func @transform_0(%arg0: i32, %arg1: i32, %arg2: i32) -> (i32, i32, i32) {
    %c1_i32 = arith.constant 1 : i32
    %0 = arith.muli %arg1, %c1_i32 : i32
    %1 = arith.addi %0, %arg2 : i32
    %c0_i32 = arith.constant 0 : i32
    %c0_i32_0 = arith.constant 0 : i32
    return %arg0, %c0_i32, %1 : i32, i32, i32
  }
  func.func @transform_1(%arg0: i32, %arg1: i32, %arg2: i32) -> (i32, i32, i32) {
    %c1_i32 = arith.constant 1 : i32
    %0 = arith.muli %arg1, %c1_i32 : i32
    %1 = arith.addi %0, %arg2 : i32
    %c0_i32 = arith.constant 0 : i32
    %c0_i32_0 = arith.constant 0 : i32
    return %arg0, %c0_i32, %1 : i32, i32, i32
  }
  func.func @transform_2(%arg0: i32, %arg1: i32, %arg2: i32) -> (i32, i32, i32, i32) {
    %c0_i32 = arith.constant 0 : i32
    %c0_i32_0 = arith.constant 0 : i32
    %c0_i32_1 = arith.constant 0 : i32
    return %arg0, %arg1, %c0_i32, %c0_i32_0 : i32, i32, i32, i32
  }
}

</mosaic_0001>

<bundles_post_ra>
// kernel: tpu_custom_call.1
= control target key start
LH: loop header
LB: loop body
LE: loop exit
PB: predicated region body
PF: predicated region fallthrough
CT: control target
= control target key end

     0   :  { %7 = vsyncpa [#allocation3], 0  ;;  %s830_s0 = inlined_call_operand.hbm [shape: f32[2,4,256], index: 0, kind: input, shape index: {}]   ;;  %s831_s1 = inlined_call_operand.vmem [shape: s8[2,1,256], index: 1, kind: input, shape index: {}]   ;;  %s832_s2 = inlined_call_operand.vmem [shape: f32[2,1,4,3], index: 2, kind: output, shape index: {}]  }
   0x1   :  { %9 = vsyncpa [#allocation3 + $0x1], 0  ;;  %s669_s9 = smov 0   ;;  %s671_s10 = smov 0  }
   0x2   :  { %s673_s11 = smov 0   ;;  %s675_s12 = smov 0  }
   0x3   :  { %s677_s13 = smov 0   ;;  %s679_s14 = smov 0  }
   0x4 LB: > { %s490_s15 = sadd.s32 4294967295, %s650_s14   ;;  %s34_s16 = sadd.s32 1, %s646_s13  ;;  %s650_s14 = sphi %s679_s14, %s15_s14   ;;  %s646_s13 = sphi %s677_s13, %s842_s13   ;;  %s642_s12 = sphi %s675_s12, %s841_s12   ;;  %s638_s11 = sphi %s673_s11, %s840_s11   ;;  %s634_s10 = sphi %s671_s10, %s839_s10   ;;  %s630_s9 = sphi %s669_s9, %s838_s9  }
   0x5   : > { %p36_p0 = scmp.ge.s32.totalorder %s34_s16, 2  ;;  %s45_s17 = sadd.s32 1, %s638_s11 }
   0x6   : > { %p52_p1 = scmp.ne.s32.totalorder %s638_s11, %s634_s10  ;;  %p53_p2 = scmp.eq.s32.totalorder %s650_s14, 0 }
   0x7   : > { %s844_s16 = smov (%p36_p0, %s34_s16), 0  ;;  %p58_p4 = scmp.ne.s32.totalorder %s634_s10, %s630_s9 }
   0x8   : > { %p705_p3 = por %p53_p2, %p52_p1  ;;  %s40_s19 = ssub.s32 %s646_s13, %s844_s16 }
   0x9   : > { %p59_p5 = scmp.eq.s32.totalorder %s490_s15, 0  ;;  %p43_p6 = scmp.eq.s32.totalorder %s40_s19, 0 }
   0xa   : > { %p513_p8 = scmp.lt.s32.totalorder %s650_s14, 2  ;;  %s140_s22 = sand.u32 1, %s638_s11  }
   0xb   : > { %p712_p7 = por %p59_p5, %p58_p4  ;;  %s506_s23 = sshll.u32 %s646_s13, 7 }
   0xc   : > { %s718_s21 = scalar_select %p43_p6, %s638_s11, %s45_s17  }
   0xd   : > { %s494_s24 = sshll.u32 %s140_s22, 3  ;;  %s725_s27 = scalar_lea.hbm %s830_s0, %s506_s23 }
   0xe   : > { %s144_s28 = scalar_lea.vmem [#allocation2], %s494_s24  ;;  %p729_p9 = pnand %p513_p8, %p705_p3 }
   0xf   : > { %s155_s29 = sshll.u32 %s144_s28, 4  ;;  %s141_s3 = scalar_lea.sflag [#allocation3], %s140_s22  ;;  %s733_s29 = int_to_ptr.vmem [resolvable:$true] %s155_s29 }
  0x10   : > { %s570_s4 = scalar_lea.hbm %s725_s27, 128  ;;  %p572_p13 = pneg %p729_p9 }
  0x11   : > { %p571_p12 = scmp.ne.s32.totalorder %s725_s27, %s570_s4  ;;  %s575_s7 = scalar_lea.hbm %s830_s0, 256 }
  0x12   : > { %p576_p2 = scmp.lt.u32.totalorder %s725_s27, %s830_s0  ;;  %p577_p3 = scmp.lt.u32.totalorder %s575_s7, %s570_s4 }
  0x13   : > { %p573_p0 = pnand %p572_p13, %p571_p12  ;;  %p579_p5 = scmp.lt.u32.totalorder %s570_s4, %s725_s27 }
  0x14   : > { %p578_p4 = por %p577_p3, %p576_p2 }
  0x15   : > { %p574_p1 = pneg %p573_p0 }
  0x16   : > { %p580_p6 = por %p579_p5, %p578_p4 }
  0x18   : > { %p581_p8 = pnand %p580_p6, %p574_p1 }
  0x1a   : > { %584 = shalt.err (!%p581_p8)
}
  0x1b   : > { %s585_s15 = scalar_lea.vmem %s733_s29, 128  ;;  %s652_s17 = smov [#allocation2]  }
  0x1c   : > { %p586_p12 = scmp.ne.s32.totalorder %s733_s29, %s585_s15  ;;  %s590_s18 = sshll.u32 %s652_s17, 4  ;;  %s591_s18 = int_to_ptr.vmem [resolvable:$false] %s590_s18 }
  0x1d   : > { %s592_s19 = scalar_lea.vmem %s591_s18, 256  ;;  %p593_p11 = scmp.lt.s32.totalorder %s733_s29, %s591_s18 }
  0x1e   : > { %p588_p0 = pnand %p586_p12, %p572_p13  ;;  %p594_p2 = scmp.lt.s32.totalorder %s592_s19, %s585_s15 }
  0x20   : > { %p589_p10 = pneg %p588_p0  ;;  %p595_p3 = por %p594_p2, %p593_p11 }
  0x22   : > { %p596_p4 = pnand %p595_p3, %p589_p10 }
  0x24   : > { %599 = shalt.err (!%p596_p4)
}
  0x25   : > { %512 = dma.hbm_to_vmem [thread:$0]  (!%p729_p9), %s725_s27, 128, %s733_s29, %s141_s3  }
  0x26   : > { %p836_p1 = scmp.lt.s32.totalorder %s650_s14, 3  ;;  %p837_p5 = scmp.ge.s32.totalorder %s650_s14, 1 }
  0x28   : > { %p175_p13 = pnand %p837_p5, %p836_p1 }
  0x29   : > { %s180_s22 = sand.u32 (!%p175_p13), 1, %s634_s10  }
  0x2a   : > { %178 = sbr.rel (%p175_p13) target bundleno = 278 (0x116), region = 28  ;;  %s498_s23 = sshll.u32 (!%p175_p13), %s180_s22, 3 }
  0x2b   : > { %s181_s24 = scalar_lea.sflag (!%p175_p13), [#allocation3], %s180_s22  ;;  %s184_s25 = scalar_lea.vmem (!%p175_p13), [#allocation2], %s498_s23 }
  0x31   : > { %625 = dma.done.wait (%p712_p7), %s181_s24, 128  }
  0x32   : > { %627 = vsyncadd (%p712_p7), %s181_s24, 4294967168  ;;  %p220_p10 = scmp.lt.s32.totalorder %s642_s12, 1  ;;  %v293_v0 = vlaneseq  ;;  %vm240_vm0 = vcmask 19456   ;;  %vm248_vm1 = vcmask 1043456   ;;  %v653_v2 = vmov 0.0   ;;  %v242_v5 = vld [vmem:[%s184_s25] sm:$0xff] }
  0x33   : > { %v246_v7 = vcombine.high %v242_v5, %v242_v5  ;;  %v249_v8 = vsel %vm248_vm1, %v242_v5, -inf }
  0x34   : > { %s846_s12 = smov (!%p220_p10, %s642_s12), 1  ;;  %v774_v1 = vshrl.u32 %v293_v0, 7  ;;  %v250_v10 = vrot.slane %v249_v8, 4 }
  0x35   : > { %s499_s26 = sshll.u32 %s846_s12, 1  ;;  %s500_s27 = sshll.u32 %s846_s12, 2  ;;  %v256_v11 = vsel %vm248_vm1, %v246_v7, -inf }
  0x36   : > { %s226_s30 = scalar_lea.vmem %s831_s1, %s499_s26  ;;  %s782_s20 = scalar_lea.vmem %s832_s2, %s500_s27  ;;  %v787_v4 = vsub.s32 0, %v774_v1  ;;  %v299_v9 = vsub.s32 4, %v774_v1  ;;  %v251_v14 = vmax.f32 %v249_v8, %v250_v10  ;;  %v257_v15 = vrot.slane %v256_v11, 4 }
  0x37   : > { %241 = vst.msk [vmem:[%s782_s20] sm:$0xf] %vm240_vm0, %v653_v2  ;;  %v243_v3 = vld [vmem:[%s226_s30] sm:$0x3] }
  0x38   : > { %v244_v6 = vunpack.c.0.s8 %v243_v3  ;;  %v252_v18 = vrot.slane %v251_v14, 2  ;;  %v258_v19 = vmax.f32 %v256_v11, %v257_v15 }
  0x3a   : > { %v323_v12 = vrot.slane %v244_v6, %v787_v4  ;;  %v327_v13 = vrot.slane %v244_v6, %v299_v9  ;;  %v253_v20 = vmax.f32 %v251_v14, %v252_v18  ;;  %v259_v21 = vrot.slane %v258_v19, 2 }
  0x3b   : > { %vm287_vm4 = vcmp.ge.s32.totalorder %v244_v6, 0 }
  0x3c   : > { %v331_v16 = vrot.slane %v323_v12, %v787_v4  ;;  %v335_v17 = vrot.slane %v327_v13, %v787_v4  ;;  %v254_v26 = vrot.slane %v253_v20, 1  ;;  %v260_v27 = vmax.f32 %v258_v19, %v259_v21 }
  0x3d   : > { %v501_v51 = vsel %vm287_vm4, 1.0, %v653_v2 }
  0x3e   : > { %vm336_vm2 = vcmp.eq.s32.totalorder %v331_v16, %v774_v1  ;;  %vm337_vm3 = vcmp.eq.s32.totalorder %v335_v17, %v774_v1  ;;  %v255_v29 = vmax.f32 %v253_v20, %v254_v26  ;;  %v261_v30 = vrot.slane %v260_v27, 1  ;;  %v381_v17 = vld [vmem:[%s782_s20] sm:$0xf] }
  0x3f   : > { %v502_v22 = vsel %vm336_vm2, 1.0, %v653_v2  ;;  %v503_v23 = vsel %vm337_vm3, 1.0, %v653_v2  ;;  %v296_v52 = vrot.slane %v501_v51, %v787_v4  ;;  %v300_v53 = vrot.slane %v501_v51, %v299_v9 }
  0x40   : > { %v365_v24 = vsel %vm248_vm1, %v502_v22, 0.0  ;;  %v366_v25 = vsel %vm248_vm1, %v503_v23, 0.0  ;;  %v262_v31 = vmax.f32 %v260_v27, %v261_v30  ;;  %v344_v61 = vcombine.low %v502_v22, %v503_v23 }
  0x41   : > { %v367_v28 = vadd.f32 %v366_v25, %v365_v24 }
  0x42   : > { %v265_v32 = vcombine.low %v255_v29, %v262_v31 }
  0x43   : > { %368 = vadd.xlane.f32.xlu1 %v367_v28 }
  0x44   : > { %v267_v33 = vsub.f32 %v242_v5, %v265_v32 }
  0x46   : > { %v268_v34 = vmul.f32 1.442695, %v267_v33 }
  0x48   : > { %564 = vpow2.f32 %v268_v34 }
  0x52   : > { %v565_v35 = vpop.eup %564 }
  0x53   : > { %v271_v36 = vcombine.high %v565_v35, %v565_v35  ;;  %v273_v37 = vsel %vm248_vm1, %v565_v35, 0.0 }
  0x54   : > { %v274_v38 = vrot.slane %v273_v37, 4 }
  0x55   : > { %v280_v39 = vsel %vm248_vm1, %v271_v36, 0.0 }
  0x56   : > { %v275_v40 = vadd.f32 %v274_v38, %v273_v37  ;;  %v281_v41 = vrot.slane %v280_v39, 4 }
  0x58   : > { %v276_v42 = vrot.slane %v275_v40, 2  ;;  %v282_v43 = vadd.f32 %v281_v41, %v280_v39 }
  0x5a   : > { %v277_v44 = vadd.f32 %v276_v42, %v275_v40  ;;  %v283_v45 = vrot.slane %v282_v43, 2 }
  0x5c   : > { %v278_v46 = vrot.slane %v277_v44, 1  ;;  %v284_v47 = vadd.f32 %v283_v45, %v282_v43 }
  0x5e   : > { %v279_v48 = vadd.f32 %v278_v46, %v277_v44  ;;  %v285_v49 = vrot.slane %v284_v47, 1 }
  0x60   : > { %v286_v50 = vadd.f32 %v285_v49, %v284_v47  ;;  %566 = vrcp.f32 %v279_v48 }
  0x62   : > { %568 = vrcp.f32 %v286_v50 }
  0x6a   : > { %v567_v54 = vpop.eup %566 }
  0x6b   : > { %v303_v55 = vmul.f32 %v567_v54, %v296_v52 }
  0x6c   : > { %v569_v56 = vpop.eup %568 }
  0x6d   : > { %v304_v57 = vmul.f32 %v569_v56, %v300_v53  ;;  %v308_v58 = vrot.slane %v303_v55, %v787_v4 }
  0x6f   : > { %v312_v59 = vrot.slane %v304_v57, %v787_v4  ;;  %v372_v4 = vand.u32 127, %v293_v0 }
  0x71   : > { %v315_v60 = vcombine.low %v308_v58, %v312_v59  ;;  %vm373_vm5 = vcmp.eq.s32.totalorder %v372_v4, 0  ;;  %vm375_vm6 = vcmp.eq.s32.totalorder %v372_v4, 1  ;;  %vm378_vm7 = vcmp.eq.s32.totalorder %v372_v4, 2 }
  0x73   : > { %v317_v62 = vmul.f32 %v565_v35, %v315_v60 }
  0x75   : > { %v346_v63 = vmul.f32 %v344_v61, %v317_v62  ;;  %v357_v1 = vcombine.high %v317_v62, %v317_v62  ;;  %v359_v6 = vsel %vm248_vm1, %v317_v62, 0.0 }
  0x77   : > { %v348_v3 = vcombine.high %v346_v63, %v346_v63  ;;  %v350_v5 = vsel %vm248_vm1, %v346_v63, 0.0  ;;  %v360_v7 = vsel %vm248_vm1, %v357_v1, 0.0 }
  0x78   : > { %v361_v9 = vadd.f32 %v360_v7, %v359_v6 }
  0x79   : > { %v351_v2 = vsel %vm248_vm1, %v348_v3, 0.0 }
  0x7a   : > { %v352_v8 = vadd.f32 %v351_v2, %v350_v5 }
  0x7c   : > { %353 = vadd.xlane.f32.xlu0 %v352_v8 }
  0x80   : > { %362 = vadd.xlane.f32.xlu0 %v361_v9 }
  0xd0   : > { %v369_v11 = vpop.xlane.xlu1 %368 }
  0xd1   : > { %v379_v15 = vsel %vm378_vm7, %v369_v11, 0.0 }
 0x109   : > { %v354_v10 = vpop.xlane.xlu0 %353 }
 0x10a   : > { %v374_v13 = vsel %vm373_vm5, %v354_v10, 0.0 }
 0x10d   : > { %v363_v12 = vpop.xlane.xlu0 %362 }
 0x10e   : > { %v376_v14 = vsel %vm375_vm6, %v363_v12, 0.0 }
 0x10f   : > { %v377_v16 = vadd.f32 %v376_v14, %v374_v13 }
 0x111   : > { %v380_v18 = vadd.f32 %v379_v15, %v377_v16 }
 0x113   : > { %v382_v19 = vadd.f32 %v381_v17, %v380_v18 }
 0x115   : > { %384 = vst.msk [vmem:[%s782_s20] sm:$0xf] %vm240_vm0, %v382_v19 }
 0x116 PF: > { %s15_s14 = sadd.s32 1, %s650_s14   ;;  %s838_s9 = smov %s634_s10 }
 0x117   : > { %p12_p7 = scmp.ge.s32.totalorder %s15_s14, 4   ;;  %s839_s10 = smov %s638_s11 }
 0x118   : > { %s840_s11 = smov %s718_s21  ;;  %s841_s12 = smov %s646_s13 }
 0x119   : > { %s842_s13 = smov %s844_s16  ;;  %14 = sbr.rel (!%p12_p7) target bundleno = 4 (0x4), region = 75 }
 0x120   :  { %410 = vsyncpa [#allocation3], 1 }
 0x121   :  { %412 = vsyncpa [#allocation3 + $0x1], 1 }

</bundles_post_ra>
